<compile_context>
chip_gen: v7x
topology: tpu7x:2x2x1
jax: 0.10.0
libtpu: 0.0.40
codegen_flags: <defaults>
</compile_context>

<pallas_src>
import jax
import jax.numpy as jnp
from jax.experimental import pallas as pl
from jax.experimental.pallas import tpu as pltpu

IN_F = 60
HID_F = 180
OUT_F = 1


def wide_kernel(x_ref, w1_ref, b1_ref, w2_ref, b2_ref, o_ref):
    # Hidden layer on the MXU: (TB, 60) @ (60, 180) -> (TB, 180), f32 accumulate.
    h = jnp.dot(x_ref[...], w1_ref[...], preferred_element_type=jnp.float32)
    h = jnp.maximum(h + b1_ref[...], 0.0)
    # Output layer (out_features == 1): VPU elementwise multiply + XLU lane
    # reduction instead of an N=1 MXU matmul.  b2 is a scalar read from SMEM.
    y = jnp.sum(h * w2_ref[...], axis=-1) + b2_ref[0, 0]            # (TB,)
    # Exact sigmoid (exp goes to the EUP).
    y = 1.0 / (1.0 + jnp.exp(-y))
    # Lane-dense store: one (1, 1, TB) slab per grid step.
    o_ref[...] = y[None, None, :].astype(o_ref.dtype)


def wide_forward(x, w1, b1, w2_row, b2, *, tb=512):
    """x:(B,60), w1:(60,180), b1:(1,180), w2_row:(1,180), b2:(1,1) -> (B,1)."""
    B = x.shape[0]
    # Small batches run as a single tile; large batches use `tb` rows per tile.
    if B <= tb:
        tb = max(8, ((B + 7) // 8) * 8)
    b_pad = ((B + tb - 1) // tb) * tb
    if b_pad != B:
        x = jnp.pad(x, ((0, b_pad - B), (0, 0)))
    num_tiles = b_pad // tb

    cost = pl.CostEstimate(
        flops=2 * b_pad * IN_F * HID_F + 4 * b_pad * HID_F,
        transcendentals=b_pad,
        bytes_accessed=4 * (b_pad * IN_F + b_pad + IN_F * HID_F + 2 * HID_F + 1),
    )

    out3d = pl.pallas_call(
        wide_kernel,
        out_shape=jax.ShapeDtypeStruct((num_tiles, 1, tb), jnp.float32),
        grid=(num_tiles,),
        in_specs=[
            pl.BlockSpec((tb, IN_F), lambda i: (i, 0)),          # x tile (pipelined)
            pl.BlockSpec((IN_F, HID_F), lambda i: (0, 0)),       # W1 (resident)
            pl.BlockSpec((1, HID_F), lambda i: (0, 0)),          # b1 (resident)
            pl.BlockSpec((1, HID_F), lambda i: (0, 0)),          # W2 row (resident)
            pl.BlockSpec(memory_space=pltpu.MemorySpace.SMEM),   # b2 scalar
        ],
        out_specs=pl.BlockSpec((1, 1, tb), lambda i: (i, 0, 0)),
        compiler_params=pltpu.CompilerParams(
            dimension_semantics=("parallel",)),
        cost_estimate=cost,
    )(x, w1, b1, w2_row, b2)

    return out3d.reshape(b_pad)[:B].reshape(B, OUT_F)


def init_params(key):
    # Deterministic init mimicking torch.nn.Linear default: U(-1/sqrt(fan_in), 1/sqrt(fan_in)).
    k1, k2, k3, k4 = jax.random.split(key, 4)
    bound1 = 1.0 / jnp.sqrt(IN_F)
    bound2 = 1.0 / jnp.sqrt(HID_F)
    w1 = jax.random.uniform(k1, (IN_F, HID_F), jnp.float32, -bound1, bound1)
    b1 = jax.random.uniform(k2, (1, HID_F), jnp.float32, -bound1, bound1)
    w2_row = jax.random.uniform(k3, (OUT_F, HID_F), jnp.float32, -bound2, bound2)
    b2 = jax.random.uniform(k4, (1, OUT_F), jnp.float32, -bound2, bound2)
    return w1, b1, w2_row, b2


def _reference(x, w1, b1, w2_row, b2):
    # Highest-precision reference so the check measures kernel error, not the
    # reference's own bf16 matmul passes.
    hp = jax.lax.Precision.HIGHEST
    h = jnp.maximum(jnp.dot(x, w1, precision=hp) + b1, 0.0)
    return jax.nn.sigmoid(jnp.dot(h, w2_row.T, precision=hp) + b2)


if __name__ == "__main__":
    key = jax.random.PRNGKey(0)
    kx, kp = jax.random.split(key)

    w1, b1, w2_row, b2 = init_params(kp)

    # Small single-tile case.
    B = 8
    x = jax.random.normal(kx, (B, IN_F), jnp.float32)
    out = jax.block_until_ready(wide_forward(x, w1, b1, w2_row, b2))
    ref = _reference(x, w1, b1, w2_row, b2)
    assert out.shape == (B, OUT_F)
    assert jnp.allclose(out, ref, atol=1e-4, rtol=1e-4), float(jnp.max(jnp.abs(out - ref)))

    # Multi-tile case exercising the pipelined, parallel batch grid (and padding).
    B2 = 600
    x2 = jax.random.normal(jax.random.PRNGKey(1), (B2, IN_F), jnp.float32)
    out2 = jax.block_until_ready(wide_forward(x2, w1, b1, w2_row, b2, tb=256))
    ref2 = _reference(x2, w1, b1, w2_row, b2)
    assert out2.shape == (B2, OUT_F)
    assert jnp.allclose(out2, ref2, atol=1e-4, rtol=1e-4), float(jnp.max(jnp.abs(out2 - ref2)))

    print("KERNEL_OK")
</pallas_src>

<mosaic_0001>
module attributes {stable_mosaic.version = 11 : i64} {
  func.func @wide_kernel(%arg0: i32, %arg1: memref<8x60xf32, #tpu.memory_space<vmem>>, %arg2: memref<60x180xf32, #tpu.memory_space<vmem>>, %arg3: memref<1x180xf32, #tpu.memory_space<vmem>>, %arg4: memref<1x180xf32, #tpu.memory_space<vmem>>, %arg5: memref<1x1xf32, #tpu.memory_space<smem>>, %arg6: memref<1x1x8xf32, #tpu.memory_space<vmem>>) attributes {dimension_semantics = [#tpu.dimension_semantics<parallel>], iteration_bounds = array<i64: 1>, scalar_prefetch = 0 : i64, scratch_operands = 0 : i64, tpu.core_type = #tpu.core_type<tc>, window_params = [{transform_indices = @transform_0, window_bounds = array<i64: 8, 60>}, {pipeline_mode = #tpu.pipeline_mode<synchronous>, transform_indices = @transform_1, window_bounds = array<i64: 60, 180>}, {pipeline_mode = #tpu.pipeline_mode<synchronous>, transform_indices = @transform_2, window_bounds = array<i64: 1, 180>}, {pipeline_mode = #tpu.pipeline_mode<synchronous>, transform_indices = @transform_3, window_bounds = array<i64: 1, 180>}, {transform_indices = @transform_4, window_bounds = array<i64: 1, 1>}, {transform_indices = @transform_5, window_bounds = array<i64: 1, 1, 8>}]} {
    %c0 = arith.constant 0 : index
    %c0_0 = arith.constant 0 : index
    %0 = vector.load %arg1[%c0, %c0_0] : memref<8x60xf32, #tpu.memory_space<vmem>>, vector<8x60xf32>
    %c0_1 = arith.constant 0 : index
    %c0_2 = arith.constant 0 : index
    %1 = vector.load %arg2[%c0_1, %c0_2] : memref<60x180xf32, #tpu.memory_space<vmem>>, vector<60x180xf32>
    %cst = arith.constant dense<0.000000e+00> : vector<8x180xf32>
    %2 = tpu.matmul %0, %1, %cst {dimension_numbers = #tpu.dot_dimension_numbers<[1], [0], [0], [1], [0, 0, 1, 1], [], []>} : vector<8x60xf32>, vector<60x180xf32>, vector<8x180xf32> -> vector<8x180xf32>
    %c0_3 = arith.constant 0 : index
    %c0_4 = arith.constant 0 : index
    %3 = vector.load %arg3[%c0_3, %c0_4] : memref<1x180xf32, #tpu.memory_space<vmem>>, vector<1x180xf32>
    %4 = vector.broadcast %3 : vector<1x180xf32> to vector<8x180xf32>
    %5 = arith.addf %2, %4 : vector<8x180xf32>
    %cst_5 = arith.constant 0.000000e+00 : f32
    %6 = vector.broadcast %cst_5 : f32 to vector<8x180xf32>
    %7 = arith.maximumf %5, %6 : vector<8x180xf32>
    %c0_6 = arith.constant 0 : index
    %c0_7 = arith.constant 0 : index
    %8 = vector.load %arg4[%c0_6, %c0_7] : memref<1x180xf32, #tpu.memory_space<vmem>>, vector<1x180xf32>
    %9 = vector.broadcast %8 : vector<1x180xf32> to vector<8x180xf32>
    %10 = arith.mulf %7, %9 : vector<8x180xf32>
    %cst_8 = arith.constant dense<0.000000e+00> : vector<8xf32>
    %11 = vector.multi_reduction <add>, %10, %cst_8 [1] : vector<8x180xf32> to vector<8xf32>
    %c0_9 = arith.constant 0 : index
    %c0_10 = arith.constant 0 : index
    %12 = memref.load %arg5[%c0_9, %c0_10] : memref<1x1xf32, #tpu.memory_space<smem>>
    %13 = vector.broadcast %12 : f32 to vector<8xf32>
    %14 = arith.addf %11, %13 : vector<8xf32>
    %cst_11 = arith.constant 0.000000e+00 : f32
    %15 = vector.broadcast %cst_11 : f32 to vector<8xf32>
    %16 = arith.subf %15, %14 : vector<8xf32>
    %17 = math.exp %16 : vector<8xf32>
    %cst_12 = arith.constant 1.000000e+00 : f32
    %18 = vector.broadcast %cst_12 : f32 to vector<8xf32>
    %19 = arith.addf %18, %17 : vector<8xf32>
    %cst_13 = arith.constant 1.000000e+00 : f32
    %20 = vector.broadcast %cst_13 : f32 to vector<8xf32>
    %21 = arith.divf %20, %19 : vector<8xf32>
    %22 = vector.shape_cast %21 : vector<8xf32> to vector<1x1x8xf32>
    %c0_14 = arith.constant 0 : index
    %c0_15 = arith.constant 0 : index
    %c0_16 = arith.constant 0 : index
    %23 = vector.load %arg6[%c0_14, %c0_15, %c0_16] : memref<1x1x8xf32, #tpu.memory_space<vmem>>, vector<1x1x8xf32>
    tpu.vector_store %arg6[%c0_14, %c0_15, %c0_16], %22 {strides = array<i32>} : memref<1x1x8xf32, #tpu.memory_space<vmem>>, vector<1x1x8xf32>,
    return
  }
  func.func @transform_0(%arg0: i32) -> (i32, i32) {
    %c0_i32 = arith.constant 0 : i32
    %c0_i32_0 = arith.constant 0 : i32
    return %arg0, %c0_i32 : i32, i32
  }
  func.func @transform_1(%arg0: i32) -> (i32, i32) {
    %c0_i32 = arith.constant 0 : i32
    %c0_i32_0 = arith.constant 0 : i32
    %c0_i32_1 = arith.constant 0 : i32
    return %c0_i32, %c0_i32_0 : i32, i32
  }
  func.func @transform_2(%arg0: i32) -> (i32, i32) {
    %c0_i32 = arith.constant 0 : i32
    %c0_i32_0 = arith.constant 0 : i32
    %c0_i32_1 = arith.constant 0 : i32
    return %c0_i32, %c0_i32_0 : i32, i32
  }
  func.func @transform_3(%arg0: i32) -> (i32, i32) {
    %c0_i32 = arith.constant 0 : i32
    %c0_i32_0 = arith.constant 0 : i32
    %c0_i32_1 = arith.constant 0 : i32
    return %c0_i32, %c0_i32_0 : i32, i32
  }
  func.func @transform_4(%arg0: i32) -> (i32, i32) {
    %c0_i32 = arith.constant 0 : i32
    %c0_i32_0 = arith.constant 0 : i32
    %c0_i32_1 = arith.constant 0 : i32
    return %c0_i32, %c0_i32_0 : i32, i32
  }
  func.func @transform_5(%arg0: i32) -> (i32, i32, i32) {
    %c0_i32 = arith.constant 0 : i32
    %c0_i32_0 = arith.constant 0 : i32
    %c0_i32_1 = arith.constant 0 : i32
    return %arg0, %c0_i32, %c0_i32_0 : i32, i32, i32
  }
}

</mosaic_0001>

<bundles_post_ra>
// kernel: tpu_custom_call.1
= control target key start
LH: loop header
LB: loop body
LE: loop exit
PB: predicated region body
PF: predicated region fallthrough
CT: control target
= control target key end

     0   :  { %11 = vsyncpa [#allocation4], 0  ;;  %s408_s0 = inlined_call_operand.hbm [shape: f32[8,60], index: 0, kind: input, shape index: {}]   ;;  %s409_s1 = inlined_call_operand.hbm [shape: f32[60,180], index: 1, kind: input, shape index: {}]   ;;  %s410_s2 = inlined_call_operand.vmem [shape: f32[1,180], index: 2, kind: input, shape index: {}]   ;;  %s411_s3 = inlined_call_operand.vmem [shape: f32[1,180], index: 3, kind: input, shape index: {}]   ;;  %s412_s4 = inlined_call_operand.<no memory space> [shape: f32[1,1], index: 4, kind: input, shape index: {}]   ;;  %s413_s5 = inlined_call_operand.hbm [shape: f32[1,1,8], index: 5, kind: output, shape index: {}]  }
   0x1   :  { %12 = vsyncpa [#allocation7], 0 }
   0x2   :  { %13 = vsyncpa [#allocation5], 0  ;;  %s319_s18 = smov [#allocation3]   ;;  %s320_s20 = smov [#allocation6]  }
   0x3   :  { %s20_s19 = sshll.u32 %s319_s18, 4  ;;  %s29_s21 = sshll.u32 %s320_s20, 4  ;;  %s21_s19 = int_to_ptr.vmem [resolvable:$true] %s20_s19  ;;  %s356_s21 = int_to_ptr.vmem [resolvable:$true] %s29_s21 }
   0x4   :  { %s247_s24 = scalar_lea.hbm %s408_s0, 128 }
   0x5   :  { %p248_p0 = scmp.ne.s32.totalorder %s408_s0, %s247_s24  ;;  %p251_p1 = scmp.lt.u32.totalorder %s247_s24, %s408_s0 }
   0x7   :  { %p253_p2 = pnand %p251_p1, %p248_p0 }
   0x9   :  { %256 = shalt.err (!%p253_p2)
}
   0xa   :  { %s257_s29 = scalar_lea.vmem %s21_s19, 128  ;;  %p262_p4 = scmp.lt.s32.totalorder %s21_s19, %s21_s19 }
   0xb   :  { %p258_p3 = scmp.ne.s32.totalorder %s21_s19, %s257_s29  ;;  %p263_p5 = scmp.lt.s32.totalorder %s257_s29, %s257_s29 }
   0xd   :  { %p264_p6 = por %p263_p5, %p262_p4 }
   0xf   :  { %p265_p7 = pnand %p264_p6, %p258_p3 }
  0x11   :  { %268 = shalt.err (!%p265_p7)
}
  0x12   :  { %23 = dma.hbm_to_vmem [thread:$0]  %s408_s0, 128, %s21_s19, [#allocation4]  }
  0x13   :  { %s269_s9 = scalar_lea.hbm %s409_s1, 2048 }
  0x14   :  { %p270_p8 = scmp.ne.s32.totalorder %s409_s1, %s269_s9  ;;  %p273_p9 = scmp.lt.u32.totalorder %s269_s9, %s409_s1 }
  0x16   :  { %p275_p10 = pnand %p273_p9, %p270_p8 }
  0x18   :  { %278 = shalt.err (!%p275_p10)
}
  0x19   :  { %s279_s14 = scalar_lea.vmem %s356_s21, 2048  ;;  %p284_p12 = scmp.lt.s32.totalorder %s356_s21, %s356_s21 }
  0x1a   :  { %p280_p11 = scmp.ne.s32.totalorder %s356_s21, %s279_s14  ;;  %p285_p13 = scmp.lt.s32.totalorder %s279_s14, %s279_s14 }
  0x1c   :  { %p286_p0 = por %p285_p13, %p284_p12 }
  0x1e   :  { %p287_p1 = pnand %p286_p0, %p280_p11 }
  0x20   :  { %290 = shalt.err (!%p287_p1)
}
  0x21   :  { %s321_s0 = smov 256   ;;  %s322_s15 = smov 16  }
  0x22   :  { %35 = dma.hbm_to_vmem [thread:$0]  %s409_s1, 2048, %s356_s21, [#allocation7], %s321_s0, %s321_s0, %s322_s15  }
  0x23   :  { %313 = dma.done.wait [#allocation4], 128  }
  0x24   :  { %314 = vsyncadd [#allocation4], 4294967168 }
  0x25   :  { %315 = dma.done.wait [#allocation7], 2048  }
  0x26   :  { %316 = vsyncadd [#allocation7], 4294965248  ;;  %v323_v0 = vmov 0.0   ;;  %v50_v1 = vld [vmem:[#allocation6 + $0x8] sm:$0xff]  ;;  %v52_v2 = vld [vmem:[#allocation6 + $0x18] sm:$0xff]  ;;  %vm81_vm0 = vcmask 1043456   ;;  %v67_v26 = vlaneseq  ;;  %v181_v46 = vstv %s412_s4 }
  0x27   :  { %152 = vmatprep.mubr.f32.mxu0 %v323_v0  ;;  %v49_v3 = vld [vmem:[#allocation6] sm:$0xff]  ;;  %v218_v4 = vpack.c.bf16 %v52_v2, %v50_v1  ;;  %v51_v5 = vld [vmem:[#allocation6 + $0x10] sm:$0xff]  ;;  %v54_v6 = vld [vmem:[#allocation6 + $0x28] sm:$0xff]  ;;  %vm324_vm1 = vmmov 1   ;;  %vm77_vm3 = vcmask 490496   ;;  %vm175_vm4 = vcmask 424960  }
  0x28   :  { %v56_v7 = vld [vmem:[#allocation6 + $0x38] sm:$0xff]  ;;  %v220_v8 = vpack.c.bf16 %v51_v5, %v49_v3  ;;  %v53_v10 = vld [vmem:[#allocation6 + $0x20] sm:$0xff]  ;;  %v55_v11 = vld [vmem:[#allocation6 + $0x30] sm:$0xff]  ;;  %v68_v27 = vshrl.u32 %v67_v26, 7  ;;  %v191_v53 = vand.u32 127, %v67_v26  ;;  %vm197_vm5 = vcmask 57344  }
  0x29   :  { %v222_v9 = vpack.c.bf16 %v56_v7, %v54_v6  ;;  %v58_v12 = vld [vmem:[#allocation6 + $0x48] sm:$0xff]  ;;  %219 = vmatprep.subr.bf16.mxu0 %v218_v4  ;;  %v60_v13 = vld [vmem:[#allocation6 + $0x58] sm:$0xff]  ;;  %v224_v14 = vpack.c.bf16 %v55_v11, %v53_v10  ;;  %v57_v16 = vld [vmem:[#allocation6 + $0x40] sm:$0xff] }
  0x2a   :  { %221 = vmatpush1.bf16.msra.mxu0 %v220_v8  ;;  %v226_v15 = vpack.c.bf16 %v60_v13, %v58_v12  ;;  %v59_v17 = vld [vmem:[#allocation6 + $0x50] sm:$0xff]  ;;  %v62_v18 = vld [vmem:[#allocation6 + $0x68] sm:$0xff]  ;;  %v64_v19 = vld [vmem:[#allocation6 + $0x78] sm:$0xf]  ;;  %v69_v28 = vsub.s32 0, %v68_v27  ;;  %v73_v30 = vsub.s32 1, %v68_v27  ;;  %v194_v54 = vsub.s32 %v191_v53, %v68_v27 }
  0x2b   :  { %223 = vmatprep.subr.bf16.mxu0 %v222_v9  ;;  %v228_v20 = vpack.c.bf16 %v59_v17, %v57_v16  ;;  %v230_v21 = vpack.c.bf16 %v64_v19, %v62_v18  ;;  %v61_v22 = vld [vmem:[#allocation6 + $0x60] sm:$0xff]  ;;  %v63_v23 = vld [vmem:[#allocation6 + $0x70] sm:$0xf]  ;;  %vm231_vm2 = vmpackc.low %vm81_vm0, %vm324_vm1 }
  0x2c   :  { %v233_v24 = vpack.c.bf16 %v63_v23, %v61_v22  ;;  %v48_v25 = vld [vmem:[#allocation3] sm:$0xff] }
  0x2d   :  { %v65_v29 = vld [vmem:[%s410_s2] sm:$0x3] }
  0x2e   :  { %225 = vmatpush1.bf16.msra.mxu0 %v224_v14  ;;  %v70_v31 = vrot.slane %v65_v29, %v69_v28  ;;  %v74_v32 = vrot.slane %v65_v29, %v73_v30  ;;  %v161_v33 = vld [vmem:[%s411_s3] sm:$0x3]  ;;  %s325_s3 = smov [#allocation8]  }
  0x2f   :  { %227 = vmatprep.subr.bf16.mxu0 %v226_v15  ;;  %v170_v38 = vrot.slane %v161_v33, %v73_v30  ;;  %v166_v40 = vrot.slane %v161_v33, %v69_v28  ;;  %s205_s22 = sshll.u32 %s325_s3, 4  ;;  %s206_s22 = int_to_ptr.vmem [resolvable:$true] %s205_s22 }
  0x30   :  { %s291_s23 = scalar_lea.vmem %s206_s22, 16  ;;  %s295_s4 = scalar_lea.vmem %s206_s22, 32 }
  0x31   :  { %p292_p2 = scmp.ne.s32.totalorder %s206_s22, %s291_s23  ;;  %p296_p3 = scmp.lt.s32.totalorder %s206_s22, %s206_s22 }
  0x32   :  { %229 = vmatpush1.bf16.msra.mxu0 %v228_v20  ;;  %p297_p4 = scmp.lt.s32.totalorder %s295_s4, %s291_s23 }
  0x33   :  { %232 = vmatprep.subr.msk.bf16.mxu0 %vm231_vm2, %v230_v21 }
  0x34   :  { %p298_p5 = por %p297_p4, %p296_p3 }
  0x36   :  { %235 = vmatpush1.bf16.msk.msra.mxu0 %vm231_vm2, %v233_v24  ;;  %p299_p6 = pnand %p298_p5, %p292_p2 }
  0x39   :  { %217 = vmatmul.mubr.msk.f32.vlgmr.msra.gmra.mrb[0].mxu0 %vm77_vm3, %v48_v25 }
 0x10c   :  { %v154_v34 = vpop.f32.mrb[0].mxu0 }
 0x10d   :  { %v155_v35 = vadd.f32 %v154_v34, %v70_v31  ;;  %v156_v36 = vpop.f32.mrb[1].mxu0 }
 0x10e   :  { %v157_v37 = vadd.f32 %v156_v36, %v74_v32 }
 0x10f   :  { %v159_v39 = vmax.f32 %v155_v35, 0.0 }
 0x110   :  { %v160_v41 = vmax.f32 %v157_v37, 0.0 }
 0x111   :  { %v173_v43 = vmul.f32 %v166_v40, %v159_v39 }
 0x112   :  { %v174_v42 = vmul.f32 %v170_v38, %v160_v41 }
 0x114   :  { %v176_v44 = vsel %vm175_vm4, %v174_v42, 0.0 }
 0x115   :  { %v177_v45 = vadd.f32 %v176_v44, %v173_v43 }
 0x117   :  { %178 = vadd.xlane.f32.xlu0 %v177_v45 }
 0x1a4   :  { %v179_v47 = vpop.xlane.xlu0 %178 }
 0x1a5   :  { %v182_v48 = vadd.f32 %v181_v46, %v179_v47 }
 0x1a7   :  { %v183_v49 = vsub.f32 0.0, %v182_v48 }
 0x1a9   :  { %v184_v50 = vmul.f32 1.442695, %v183_v49 }
 0x1ab   :  { %243 = vpow2.f32 %v184_v50 }
 0x1b5   :  { %v244_v51 = vpop.eup %243 }
 0x1b6   :  { %v186_v52 = vadd.f32 1.0, %v244_v51 }
 0x1b8   :  { %245 = vrcp.f32 %v186_v52 }
 0x1c2   :  { %v246_v55 = vpop.eup %245 }
 0x1c3   :  { %v195_v56 = vrot.slane %v246_v55, %v194_v54 }
 0x1c5   :  { %198 = vst.msk [vmem:[#allocation8] sm:$0x1] %vm197_vm5, %v195_v56 }
 0x1c6   :  { %302 = shalt.err (!%p299_p6)
}
 0x1c7   :  { %s303_s26 = scalar_lea.hbm %s413_s5, 16 }
 0x1c8   :  { %p304_p7 = scmp.ne.s32.totalorder %s413_s5, %s303_s26  ;;  %p307_p8 = scmp.lt.u32.totalorder %s303_s26, %s413_s5 }
 0x1ca   :  { %p309_p9 = pnand %p307_p8, %p304_p7 }
 0x1cc   :  { %312 = shalt.err (!%p309_p9)
}
 0x1cd   :  { %208 = dma.vmem_to_hbm [thread:$0]  %s206_s22, 16, %s413_s5, [#allocation5]  }
 0x1ce   :  { %317 = dma.done.wait [#allocation5], 16  }
 0x1cf   :  { %318 = vsyncadd [#allocation5], 4294967280 }
 0x1d0   :  { %212 = vsyncpa [#allocation4], 1 }
 0x1d1   :  { %213 = vsyncpa [#allocation7], 1 }
 0x1d2   :  { %214 = vsyncpa [#allocation5], 1 }

</bundles_post_ra>
